<compile_context>
chip_gen: v7x
topology: tpu7x:2x2x1
jax: 0.10.0
libtpu: 0.0.40
codegen_flags: <defaults>
</compile_context>

<pallas_src>
import functools
import math

import jax
import jax.numpy as jnp
from jax import lax
from jax.experimental import pallas as pl
from jax.experimental.pallas import tpu as pltpu

LANE = 128
SUBLANE = 8
_TILE_ROWS = 8192            # streaming tile: (8192,128) f32 = 4 MiB, bf16 = 2 MiB


def _vmem_limit_bytes():
    """Generation-aware VMEM budget: ~75% of physical, capped at 96 MiB."""
    try:
        cap = int(pltpu.get_tpu_info().vmem_capacity_bytes)
        if cap <= 0:
            raise ValueError
    except Exception:
        cap = 64 * 1024 * 1024       # conservative fallback (v7x per-TC VMEM)
    return min(cap * 3 // 4, 96 * 1024 * 1024)


def _qrelu_resident_kernel(x_ref, o_ref, *, num_bits, n_valid, needs_mask):
    """Whole slab resident in VMEM: relu + global min/max + fake-quant."""
    # TODO(synk): overlap DMA-in / VALU pass / DMA-out for multi-MiB slabs by
    # tiling the quantize+writeback over row blocks while keeping the slab
    # resident (currently fully serialized on the no-grid path).
    qmax = jnp.float32(2.0 ** num_bits - 1.0)
    x = jnp.maximum(x_ref[...].astype(jnp.float32), 0.0)
    if needs_mask:
        rows, lanes = x.shape
        row_ids = lax.broadcasted_iota(jnp.int32, (rows, lanes), 0)
        lane_ids = lax.broadcasted_iota(jnp.int32, (rows, lanes), 1)
        valid = row_ids * lanes + lane_ids < n_valid
        min_val = jnp.min(jnp.where(valid, x, jnp.float32(jnp.inf)))
        max_val = jnp.max(jnp.where(valid, x, jnp.float32(-jnp.inf)))
    else:
        min_val = jnp.min(x)
        max_val = jnp.max(x)
    scale = (max_val - min_val) / qmax
    safe_scale = jnp.where(scale == 0.0, jnp.float32(1.0), scale)
    zero_point = jnp.float32(0.0) - jnp.round(min_val / safe_scale)
    x_q = jnp.clip(jnp.round(x / safe_scale + zero_point), 0.0, qmax)
    x_dq = (x_q - zero_point) * safe_scale
    o_ref[...] = jnp.where(min_val == max_val, x, x_dq).astype(o_ref.dtype)


def _qrelu_minmax_kernel(x_ref, min_ref, max_ref, *, n_valid, needs_mask):
    """Streaming phase 1: per-tile (8,128) relu-min/max partials (parallel)."""
    x = jnp.maximum(x_ref[...].astype(jnp.float32), 0.0)
    rows, lanes = x.shape
    if needs_mask:
        # TODO(synk): int32 global index overflows for tensors > 2**31 elems.
        row_ids = lax.broadcasted_iota(jnp.int32, (rows, lanes), 0)
        lane_ids = lax.broadcasted_iota(jnp.int32, (rows, lanes), 1)
        gidx = (pl.program_id(0) * rows + row_ids) * lanes + lane_ids
        valid = gidx < n_valid
        x_min = jnp.where(valid, x, jnp.float32(jnp.inf))
        x_max = jnp.where(valid, x, jnp.float32(-jnp.inf))
    else:
        x_min = x
        x_max = x
    # Vreg-sized partials: reduce across sublane groups (pure VALU, no XLU per
    # tile); only 4 KiB of partials written back to HBM per tile.
    min_ref[...] = jnp.min(x_min.reshape(-1, SUBLANE, LANE), axis=0).reshape(
        1, SUBLANE, LANE)
    max_ref[...] = jnp.max(x_max.reshape(-1, SUBLANE, LANE), axis=0).reshape(
        1, SUBLANE, LANE)


def _qrelu_quant_kernel(params_ref, x_ref, o_ref, *, num_bits):
    """Streaming phase 2: relu + quantize/dequantize with SMEM scalars."""
    qmax = jnp.float32(2.0 ** num_bits - 1.0)
    safe_scale = params_ref[0]
    zero_point = params_ref[1]
    degenerate = params_ref[2]
    x = jnp.maximum(x_ref[...].astype(jnp.float32), 0.0)
    x_q = jnp.clip(jnp.round(x / safe_scale + zero_point), 0.0, qmax)
    x_dq = (x_q - zero_point) * safe_scale
    o_ref[...] = jnp.where(degenerate > 0.5, x, x_dq).astype(o_ref.dtype)


@functools.partial(jax.jit, static_argnames=("num_bits",))
def quantized_relu(x, num_bits=8):
    """ReLU followed by per-tensor fake quantization (QuantizedReLU.forward)."""
    orig_shape = x.shape
    orig_dtype = x.dtype
    n = int(math.prod(orig_shape)) if orig_shape else 1
    if n == 0:
        return jnp.maximum(x, 0).astype(orig_dtype)

    # Native-dtype kernel I/O for low-precision floats; fall back to f32 math
    # for anything else.  TODO(synk): round-trip is lossy for integer inputs.
    if jnp.issubdtype(orig_dtype, jnp.floating) and jnp.dtype(orig_dtype).itemsize <= 4:
        io_dtype = jnp.dtype(orig_dtype)
    else:
        io_dtype = jnp.dtype(jnp.float32)

    flat = x.reshape(-1)
    if flat.dtype != io_dtype:
        flat = flat.astype(io_dtype)

    # Only pad (a whole-tensor copy) when n is not lane-aligned, and only by
    # <=127 elements; padded values are masked in-kernel so zeros are safe.
    # TODO(synk): drive a 1-D BlockSpec directly to avoid even this pad.
    pad = (-n) % LANE
    if pad:
        flat = jnp.pad(flat, (0, pad))
    rows = (n + pad) // LANE
    x2d = flat.reshape(rows, LANE)

    vmem_limit = _vmem_limit_bytes()
    itemsize = io_dtype.itemsize
    # Resident budget: in + out slabs (native dtype) + ~2 f32-sized temps
    # (the global reduce keeps the relu'd f32 slab live).
    resident_bytes = rows * LANE * (2 * itemsize + 2 * 4)
    use_fast = resident_bytes <= int(vmem_limit * 0.85)

    if use_fast:
        out2d = pl.pallas_call(
            functools.partial(_qrelu_resident_kernel, num_bits=num_bits,
                              n_valid=n, needs_mask=pad > 0),
            out_shape=jax.ShapeDtypeStruct((rows, LANE), io_dtype),
            compiler_params=pltpu.CompilerParams(
                vmem_limit_bytes=vmem_limit),
        )(x2d)
    else:
        n_tiles = -(-rows // _TILE_ROWS)
        covered = n_tiles * _TILE_ROWS * LANE
        tile_mask = covered != n       # any padded / out-of-bounds elements?
        cparams = pltpu.CompilerParams(
            dimension_semantics=("parallel",),
            vmem_limit_bytes=vmem_limit)

        # Pass 1: per-tile relu-min/max partials, parallel over tiles (both
        # TensorCores on v7x), reduced to scalars in plain JAX below.
        min_parts, max_parts = pl.pallas_call(
            functools.partial(_qrelu_minmax_kernel, n_valid=n,
                              needs_mask=tile_mask),
            out_shape=(
                jax.ShapeDtypeStruct((n_tiles, SUBLANE, LANE), jnp.float32),
                jax.ShapeDtypeStruct((n_tiles, SUBLANE, LANE), jnp.float32)),
            grid=(n_tiles,),
            in_specs=[pl.BlockSpec((_TILE_ROWS, LANE), lambda i: (i, 0))],
            out_specs=(
                pl.BlockSpec((1, SUBLANE, LANE), lambda i: (i, 0, 0)),
                pl.BlockSpec((1, SUBLANE, LANE), lambda i: (i, 0, 0))),
            compiler_params=cparams,
        )(x2d)

        qmax = jnp.float32(2.0 ** num_bits - 1.0)
        min_val = jnp.min(min_parts)
        max_val = jnp.max(max_parts)
        scale = (max_val - min_val) / qmax
        safe_scale = jnp.where(scale == 0.0, jnp.float32(1.0), scale)
        zero_point = jnp.float32(0.0) - jnp.round(min_val / safe_scale)
        degenerate = (min_val == max_val).astype(jnp.float32)
        params = jnp.stack([safe_scale, zero_point, degenerate,
                            jnp.float32(0.0)])

        # Pass 2: relu + fake-quant, parallel over tiles, scalars via SMEM.
        out2d = pl.pallas_call(
            functools.partial(_qrelu_quant_kernel, num_bits=num_bits),
            out_shape=jax.ShapeDtypeStruct((rows, LANE), io_dtype),
            grid=(n_tiles,),
            in_specs=[
                pl.BlockSpec(memory_space=pltpu.MemorySpace.SMEM),
                pl.BlockSpec((_TILE_ROWS, LANE), lambda i: (i, 0))],
            out_specs=pl.BlockSpec((_TILE_ROWS, LANE), lambda i: (i, 0)),
            compiler_params=cparams,
        )(params, x2d)

    out_flat = out2d.reshape(-1)
    if pad:
        out_flat = out_flat[:n]
    result = out_flat.reshape(orig_shape)
    if result.dtype != orig_dtype:
        result = result.astype(orig_dtype)
    return result


def _reference(x, num_bits=8):
    """Pure-JAX mirror of QuantizedReLU.forward (PyTorch formulation)."""
    x = jnp.maximum(x.astype(jnp.float32), 0.0)
    qmin, qmax = 0.0, 2.0 ** num_bits - 1.0
    min_val, max_val = jnp.min(x), jnp.max(x)
    scale = (max_val - min_val) / (qmax - qmin)
    safe_scale = jnp.where(scale == 0.0, 1.0, scale)
    zero_point = qmin - jnp.round(min_val / safe_scale)
    x_q = jnp.clip(jnp.round(x / safe_scale + zero_point), qmin, qmax)
    x_dq = (x_q - zero_point) * safe_scale
    return jnp.where(min_val == max_val, x, x_dq)


def _check(name, x, num_bits=8):
    out = jax.block_until_ready(quantized_relu(x, num_bits=num_bits))
    assert out.shape == x.shape and out.dtype == x.dtype, name
    ref = _reference(x, num_bits=num_bits).astype(x.dtype).astype(jnp.float32)
    err = jnp.abs(out.astype(jnp.float32) - ref)
    x_relu = jnp.maximum(x.astype(jnp.float32), 0.0)
    step = (jnp.max(x_relu) - jnp.min(x_relu)) / (2.0 ** num_bits - 1.0)
    # Allow at most one quant step of slack for rounding-boundary differences.
    assert bool(jnp.all(err <= step + 1e-5)), f"{name}: error exceeds one quant step"


if __name__ == "__main__":
    key = jax.random.PRNGKey(0)
    k1, k2, k3, k4 = jax.random.split(key, 4)

    # Primary case: small NCHW conv-net activation (resident fast path).
    x_small = jax.random.normal(k1, (2, 4, 16, 16), dtype=jnp.float32)
    _check("small", x_small)

    # Ragged element count (exercises in-kernel tail masking, fast path).
    x_ragged = jax.random.normal(k2, (2, 3, 15, 17), dtype=jnp.float32)
    _check("ragged", x_ragged)

    # Degenerate case: min == max -> module returns relu(x) unchanged.
    x_const = jnp.full((2, 4, 16, 16), 1.5, dtype=jnp.float32)
    _check("constant", x_const)

    # Native bf16 I/O (fast path, no wrapper-side f32 round trip).
    x_bf16 = jax.random.normal(k3, (2, 8, 16, 24), dtype=jnp.bfloat16)
    _check("bf16", x_bf16)

    # Larger activation (> resident threshold on every generation): exercises
    # the two-pass parallel streaming path including a ragged last tile.
    x_big = jax.random.normal(k4, (8, 63, 128, 128), dtype=jnp.float32)
    _check("streaming", x_big)

    print("KERNEL_OK")
</pallas_src>

<mosaic_0001>
module attributes {stable_mosaic.version = 11 : i64} {
  func.func @_qrelu_resident_kernel(%arg0: memref<16x128xf32, #tpu.memory_space<vmem>>, %arg1: memref<16x128xf32, #tpu.memory_space<vmem>>) attributes {dimension_semantics = [], scalar_prefetch = 0 : i64, scratch_operands = 0 : i64, tpu.core_type = #tpu.core_type<tc>} {
    %c0 = arith.constant 0 : index
    %c0_0 = arith.constant 0 : index
    %0 = vector.load %arg0[%c0, %c0_0] : memref<16x128xf32, #tpu.memory_space<vmem>>, vector<16x128xf32>
    %cst = arith.constant 0.000000e+00 : f32
    %1 = vector.broadcast %cst : f32 to vector<16x128xf32>
    %2 = arith.maximumf %0, %1 : vector<16x128xf32>
    %3 = vector.shape_cast %2 : vector<16x128xf32> to vector<1x16x128xf32>
    %cst_1 = arith.constant dense<0x7F800000> : vector<1xf32>
    %4 = vector.multi_reduction <minimumf>, %3, %cst_1 [1, 2] : vector<1x16x128xf32> to vector<1xf32>
    %5 = vector.shape_cast %4 : vector<1xf32> to vector<1x1x1xf32>
    %6 = vector.extract %5[0, 0, 0] : f32 from vector<1x1x1xf32>
    %7 = vector.shape_cast %2 : vector<16x128xf32> to vector<1x16x128xf32>
    %cst_2 = arith.constant dense<0xFF800000> : vector<1xf32>
    %8 = vector.multi_reduction <maximumf>, %7, %cst_2 [1, 2] : vector<1x16x128xf32> to vector<1xf32>
    %9 = vector.shape_cast %8 : vector<1xf32> to vector<1x1x1xf32>
    %10 = vector.extract %9[0, 0, 0] : f32 from vector<1x1x1xf32>
    %11 = arith.subf %10, %6 : f32
    %cst_3 = arith.constant 2.550000e+02 : f32
    %12 = arith.divf %11, %cst_3 : f32
    %cst_4 = arith.constant 0.000000e+00 : f32
    %13 = arith.cmpf oeq, %12, %cst_4 : f32
    %cst_5 = arith.constant 1.000000e+00 : f32
    %14 = arith.select %13, %cst_5, %12 : f32
    %15 = arith.divf %6, %14 : f32
    %16 = math.roundeven %15 : f32
    %cst_6 = arith.constant 0.000000e+00 : f32
    %17 = arith.subf %cst_6, %16 : f32
    %18 = vector.broadcast %14 : f32 to vector<16x128xf32>
    %19 = arith.divf %2, %18 : vector<16x128xf32>
    %20 = vector.broadcast %17 : f32 to vector<16x128xf32>
    %21 = arith.addf %19, %20 : vector<16x128xf32>
    %22 = math.roundeven %21 : vector<16x128xf32>
    %cst_7 = arith.constant 0.000000e+00 : f32
    %cst_8 = arith.constant 2.550000e+02 : f32
    %23 = vector.broadcast %cst_7 : f32 to vector<16x128xf32>
    %24 = arith.maximumf %23, %22 : vector<16x128xf32>
    %25 = vector.broadcast %cst_8 : f32 to vector<16x128xf32>
    %26 = arith.minimumf %25, %24 : vector<16x128xf32>
    %27 = vector.broadcast %17 : f32 to vector<16x128xf32>
    %28 = arith.subf %26, %27 : vector<16x128xf32>
    %29 = vector.broadcast %14 : f32 to vector<16x128xf32>
    %30 = arith.mulf %28, %29 : vector<16x128xf32>
    %31 = arith.cmpf oeq, %6, %10 : f32
    %32 = arith.select %31, %2, %30 : vector<16x128xf32>
    %c0_9 = arith.constant 0 : index
    %c0_10 = arith.constant 0 : index
    %33 = vector.load %arg1[%c0_9, %c0_10] : memref<16x128xf32, #tpu.memory_space<vmem>>, vector<16x128xf32>
    tpu.vector_store %arg1[%c0_9, %c0_10], %32 {strides = array<i32>} : memref<16x128xf32, #tpu.memory_space<vmem>>, vector<16x128xf32>,
    return
  }
}

</mosaic_0001>

<bundles_post_ra>
// kernel: quantized_relu.1
= control target key start
LH: loop header
LB: loop body
LE: loop exit
PB: predicated region body
PF: predicated region fallthrough
CT: control target
= control target key end

     0   :  { %s124_s0 = inlined_call_operand.vmem [shape: f32[16,128], index: 0, kind: input, shape index: {}]   ;;  %s125_s1 = inlined_call_operand.vmem [shape: f32[16,128], index: 1, kind: output, shape index: {}]  }
   0x1   :  { %v8_v0 = vld [vmem:[%s124_s0] sm:$0xff]  ;;  %v9_v1 = vld [vmem:[%s124_s0 + $0x8] sm:$0xff] }
   0x2   :  { %v106_v2 = vmax.f32 %v8_v0, 0.0  ;;  %v108_v3 = vmax.f32 %v9_v1, 0.0 }
   0x4   :  { %v12_v4 = vmin.f32 %v106_v2, %v108_v3  ;;  %v22_v5 = vmax.f32 %v106_v2, %v108_v3 }
   0x6   :  { %13 = vmin.xlane.f32.xlu0 %v12_v4 }
   0xa   :  { %23 = vmax.xlane.f32.xlu0 %v22_v5 }
  0x93   :  { %v14_v6 = vpop.xlane.xlu0 %13 }
  0x94   :  { %v15_v7 = vrot.slane %v14_v6, 4 }
  0x96   :  { %v16_v8 = vmin.f32 %v14_v6, %v15_v7 }
  0x97   :  { %v24_v9 = vpop.xlane.xlu0 %23 }
  0x98   :  { %v17_v10 = vrot.slane %v16_v8, 2  ;;  %v25_v11 = vrot.slane %v24_v9, 4 }
  0x9a   :  { %v26_v12 = vmax.f32 %v24_v9, %v25_v11  ;;  %v18_v13 = vmin.f32 %v16_v8, %v17_v10 }
  0x9c   :  { %v27_v14 = vrot.slane %v26_v12, 2  ;;  %v19_v15 = vrot.slane %v18_v13, 1 }
  0x9e   :  { %v28_v16 = vmax.f32 %v26_v12, %v27_v14  ;;  %v20_v17 = vmin.f32 %v18_v13, %v19_v15 }
  0xa0   :  { %80 = vpush %v20_v17  ;;  %v29_v18 = vrot.slane %v28_v16, 1 }
  0xa2   :  { %v30_v19 = vmax.f32 %v28_v16, %v29_v18 }
  0xa4   :  { %82 = vpush %v30_v19 }
  0xd1   :  { %s81_s0 = spop %80 }
  0xd5   :  { %s83_s10 = spop %82 }
  0xd6   :  { %s32_s11 = ssub.f32 %s83_s10, %s81_s0  ;;  %p68_p2 = scmp.eq.f32.partialorder %s81_s0, %s83_s10 }
  0xd8   :  { %s35_s12 = smul.f32 0.003921569, %s32_s11 }
  0xd9   :  { %s69_s22 = scalar_select %p68_p2, 1, 0 }
  0xda   :  { %p36_p0 = scmp.eq.f32.partialorder %s35_s12, 0.0 }
  0xdb   :  { %v70_v33 = vstv %s69_s22 }
  0xdc   :  { %s127_s12 = smov (%p36_p0, %s35_s12), 1.0  ;;  %vm71_vm0 = vcmp.eq.s32.totalorder %v70_v33, 1 }
  0xdd   :  { %v38_v20 = vstv %s127_s12 }
  0xde   :  { %88 = vrcp.f32 %v38_v20 }
  0xe8   :  { %v89_v21 = vpop.eup %88 }
  0xe9   :  { %84 = vpush %v89_v21  ;;  %v53_v22 = vmul.f32 %v89_v21, %v106_v2  ;;  %v54_v23 = vmul.f32 %v89_v21, %v108_v3 }
 0x11a   :  { %s85_s13 = spop %84 }
 0x11b   :  { %s41_s14 = smul.f32 %s85_s13, %s81_s0 }
 0x11d   :  { %s42_s15 = scvt.f32.s32 %s41_s14  ;;  %s47_s16 = sand.u32 2147483647, %s41_s14 }
 0x11e   :  { %s45_s18 = sand.u32 2147483648, %s41_s14  ;;  %p48_p1 = scmp.lt.f32.partialorder %s47_s16, 2.1474836e+09 }
 0x11f   :  { %s43_s17 = scvt.s32.f32 %s42_s15 }
 0x121   :  { %s44_s19 = sand.u32 2147483647, %s43_s17 }
 0x122   :  { %s46_s20 = sor.u32 %s45_s18, %s44_s19 }
 0x123   :  { %s129_s20 = smov (!%p48_p1, %s46_s20), %s41_s14 }
 0x124   :  { %s50_s21 = ssub.f32 0.0, %s129_s20 }
 0x126   :  { %v55_v24 = vstv %s50_s21 }
 0x127   :  { %v56_v25 = vadd.f32 %v55_v24, %v53_v22  ;;  %v57_v26 = vadd.f32 %v55_v24, %v54_v23 }
 0x129   :  { %v86_v27 = vround.rtne.f32 %v56_v25  ;;  %v87_v28 = vround.rtne.f32 %v57_v26 }
 0x12b   :  { %v60_v29 = vmax.f32 %v86_v27, 0.0  ;;  %v61_v30 = vmax.f32 %v87_v28, 0.0 }
 0x12d   :  { %v62_v31 = vmin.f32 %v60_v29, 255.0  ;;  %v63_v32 = vmin.f32 %v61_v30, 255.0 }
 0x12f   :  { %v64_v34 = vsub.f32 %v62_v31, %v55_v24  ;;  %v65_v35 = vsub.f32 %v63_v32, %v55_v24 }
 0x131   :  { %v66_v36 = vmul.f32 %v64_v34, %v38_v20  ;;  %v67_v37 = vmul.f32 %v65_v35, %v38_v20 }
 0x133   :  { %v72_v38 = vsel %vm71_vm0, %v106_v2, %v66_v36  ;;  %v73_v39 = vsel %vm71_vm0, %v108_v3, %v67_v37 }
 0x134   :  { %74 = vst [vmem:[%s125_s1] sm:$0xff] %v72_v38  ;;  %75 = vst [vmem:[%s125_s1 + $0x8] sm:$0xff] %v73_v39 }

</bundles_post_ra>
